<compile_context>
chip_gen: v7x
topology: tpu7x:2x2x1
jax: 0.10.0
libtpu: 0.0.40
codegen_flags: <defaults>
</compile_context>

<pallas_src>
import functools

import numpy as np
import jax
import jax.numpy as jnp
from jax.experimental import pallas as pl
from jax.experimental.pallas import tpu as pltpu

OUT_LANES = 128   # every post-conv layer padded to one full lane tile (unmasked stores)
SUBLANE = 8       # f32 sublane tile; batch is padded up to a multiple of this


# ----------------------------- fused Pallas kernel ----------------------------
def _dqn_fused_kernel(x_ref, phase_ref, wq_ref, w_ref, b_ref, out_ref, *, cfg):
    f32, bf16 = jnp.float32, jnp.bfloat16
    n_in, n_cv, P = cfg["n_in"], cfg["n_conv"], cfg["phase_shape"]
    r_p, r_h, r_o = cfg["r_p"], cfg["r_h"], cfg["r_o"]
    ob1, ob2, obmp, obh, obo = cfg["ob1"], cfg["ob2"], cfg["obmp"], cfg["obh"], cfg["obo"]
    os1, os2 = cfg["os1"], cfg["os2"]

    # int8 folded-conv weights -> bf16; dequant scales applied to the f32 dot result.
    w1 = wq_ref[0:n_in, :].astype(f32).astype(bf16)              # [n_in,  n_cv]
    w2 = wq_ref[n_in:n_in + n_cv, :].astype(f32).astype(bf16)    # [n_cv,  n_cv]
    s1 = b_ref[:, os1:os1 + 1]                                   # [1, 1] f32
    s2 = b_ref[:, os2:os2 + 1]

    # --- CNNBase: conv1 -> ReLU -> conv2 -> ReLU (folded dense MXU matmuls)
    x = x_ref[...].astype(bf16)                                  # [B, n_in]
    a = jnp.dot(x, w1, preferred_element_type=f32) * s1 + b_ref[:, ob1:ob1 + n_cv]
    a = jnp.maximum(a, 0.0)                                      # [B, n_cv]
    a = jnp.dot(a.astype(bf16), w2, preferred_element_type=f32) * s2 + b_ref[:, ob2:ob2 + n_cv]
    a = jnp.maximum(a, 0.0)                                      # [B, n_cv]

    # --- cnn-fc + phase-MLP fused into one lane-dense result:
    #     lanes [0, hidden) = map_out, lanes [hidden, hidden+P) = phase_out, rest 0.
    mp = (jnp.dot(a.astype(bf16), w_ref[0:n_cv, :], preferred_element_type=f32)
          + jnp.dot(phase_ref[...].astype(bf16), w_ref[r_p:r_p + P, :],
                    preferred_element_type=f32)
          + b_ref[:, obmp:obmp + OUT_LANES])
    mp = jnp.maximum(mp, 0.0)                                    # [B, 128]

    # --- hidden MLP: concat replaced by a zero-padded [128, 128] weight.
    h = (jnp.dot(mp.astype(bf16), w_ref[r_h:r_h + OUT_LANES, :], preferred_element_type=f32)
         + b_ref[:, obh:obh + OUT_LANES])
    h = jnp.maximum(h, 0.0)                                      # [B, 128]

    # --- output Linear, lane-dense store (padded columns are exactly 0.0; the
    #     wrapper slices [:, :action_space] -- do not argmax the padded buffer).
    out_ref[...] = (jnp.dot(h.astype(bf16), w_ref[r_o:r_o + OUT_LANES, :],
                            preferred_element_type=f32)
                    + b_ref[:, obo:obo + OUT_LANES])


def _forward_impl(params, phase, obs_map, *, cfg):
    """phase: [B, P] f32, obs_map: [B, n_nodes, F] f32 -> Q-values [B, action_space]."""
    wq, w, b = params
    B = obs_map.shape[0]
    Bp = max(SUBLANE, ((B + SUBLANE - 1) // SUBLANE) * SUBLANE)   # pad to a sublane tile
    x = obs_map.reshape(B, -1)                                    # node-major, channel-fast
    if Bp != B:
        x = jnp.pad(x, ((0, Bp - B), (0, 0)))
        phase = jnp.pad(phase, ((0, Bp - B), (0, 0)))

    n_in, n_cv, P = cfg["n_in"], cfg["n_conv"], cfg["phase_shape"]
    flops = 2 * Bp * (n_in * n_cv + n_cv * n_cv + n_cv * OUT_LANES
                      + P * OUT_LANES + 2 * OUT_LANES * OUT_LANES)
    bytes_accessed = (x.size * 4 + phase.size * 4 + wq.size + w.size * 2
                      + b.size * 4 + Bp * OUT_LANES * 4)

    out_pad = pl.pallas_call(
        functools.partial(_dqn_fused_kernel, cfg=cfg),
        out_shape=jax.ShapeDtypeStruct((Bp, OUT_LANES), jnp.float32),
        in_specs=[pl.BlockSpec(memory_space=pltpu.MemorySpace.VMEM)] * 5,
        out_specs=pl.BlockSpec(memory_space=pltpu.MemorySpace.VMEM),
        cost_estimate=pl.CostEstimate(flops=flops, transcendentals=0,
                                      bytes_accessed=bytes_accessed),
    )(x, phase, wq, w, b)
    return out_pad[:B, :cfg["action_space"]]


# --------------------------- init-time parameter prep --------------------------
def _uniform(key, shape, fan_in):
    bound = 1.0 / float(fan_in) ** 0.5
    return jax.random.uniform(key, shape, jnp.float32, -bound, bound)


def _init_linear(key, fan_in, fan_out):
    kw, kb = jax.random.split(key)
    return _uniform(kw, (fan_in, fan_out), fan_in), _uniform(kb, (fan_out,), fan_in)


def _init_conv3x3(key, cin, cout):
    kw, kb = jax.random.split(key)
    fan_in = 9 * cin
    return _uniform(kw, (3, 3, cin, cout), fan_in), _uniform(kb, (cout,), fan_in)


def _fold_conv3x3_to_dense(wk, bk, H, W):
    """Fold conv3x3 (pad=1, stride=1) over a fixed HxW grid into an equivalent dense
    matrix on node-major/channel-fast flattened activations.  One-time, init only."""
    wk = np.asarray(wk, np.float32)
    bk = np.asarray(bk, np.float32)
    cin, cout = wk.shape[2], wk.shape[3]
    dense = np.zeros((H * W * cin, H * W * cout), np.float32)
    for ho in range(H):
        for wo in range(W):
            for dy in range(3):
                for dx in range(3):
                    hi, wi = ho + dy - 1, wo + dx - 1
                    if 0 <= hi < H and 0 <= wi < W:
                        ri = (hi * W + wi) * cin
                        ro = (ho * W + wo) * cout
                        dense[ri:ri + cin, ro:ro + cout] = wk[dy, dx]
    return dense, np.tile(bk, H * W)


def _quantize_int8(w):
    """Symmetric per-matrix int8 quantization; structural zeros stay exactly zero."""
    amax = float(np.max(np.abs(w)))
    scale = amax / 127.0 if amax > 0.0 else 1.0
    q = np.clip(np.rint(w / scale), -127, 127).astype(np.int8)
    return q, np.float32(scale)


# --------------------------------- the module -----------------------------------
class DQNMapNetPallas:
    def __init__(self, key, hidden_size, obs_length, phase_shape, map_shape, action_space):
        C, H, W = map_shape            # features = 12+4, n_nodes = H*W
        assert hidden_size + phase_shape <= OUT_LANES and action_space <= OUT_LANES
        self.map_shape = map_shape
        self.action_space = action_space
        keys = jax.random.split(key, 6)

        # Raw f32 parameters (assumed CNNBase/MLP structure), kept for the reference math.
        conv1 = _init_conv3x3(keys[0], C, 32)
        conv2 = _init_conv3x3(keys[1], 32, 32)
        cnn_fc = _init_linear(keys[2], 32 * H * W, hidden_size)
        phase_fc = _init_linear(keys[3], phase_shape, phase_shape)
        hidden_fc = _init_linear(keys[4], hidden_size + phase_shape, hidden_size)
        out_fc = _init_linear(keys[5], hidden_size, action_space)
        self._raw = dict(conv1=conv1, conv2=conv2, cnn_fc=cnn_fc,
                         phase=phase_fc, hidden=hidden_fc, out=out_fc)

        # ---------- one-time packing for the fused kernel ----------
        n_in, n_cv, P, hid = H * W * C, 32 * H * W, phase_shape, hidden_size

        # (1) folded convs -> int8 slab [n_in + n_cv, n_cv] (per-matrix scales).
        w1d, b1d = _fold_conv3x3_to_dense(*conv1, H, W)          # [n_in,  n_cv]
        w2d, b2d = _fold_conv3x3_to_dense(*conv2, H, W)          # [n_cv,  n_cv]
        q1, s1 = _quantize_int8(w1d)
        q2, s2 = _quantize_int8(w2d)
        wq = np.concatenate([q1, q2], axis=0)                    # int8, rows 16/32-aligned

        # (2) remaining weights -> one bf16 slab [rows, 128], 16-aligned row bands.
        r_p = n_cv                                               # phase fc band
        r_h = ((n_cv + P + 15) // 16) * 16                       # hidden band
        r_o = r_h + OUT_LANES                                    # output band
        rows = r_o + OUT_LANES
        slab = np.zeros((rows, OUT_LANES), np.float32)
        slab[0:n_cv, 0:hid] = np.asarray(cnn_fc[0])              # m -> lanes [0, hid)
        slab[r_p:r_p + P, hid:hid + P] = np.asarray(phase_fc[0]) # p -> lanes [hid, hid+P)
        slab[r_h:r_h + hid + P, 0:hid] = np.asarray(hidden_fc[0])  # concat order [m | p]
        slab[r_o:r_o + hid, 0:action_space] = np.asarray(out_fc[0])

        # (3) biases + dequant scales -> one f32 row, 128-aligned sub-ranges.
        ob1, ob2 = 0, n_cv
        obmp, obh, obo = 2 * n_cv, 2 * n_cv + 128, 2 * n_cv + 256
        os1, os2 = 2 * n_cv + 384, 2 * n_cv + 512
        brow = np.zeros((1, 2 * n_cv + 640), np.float32)
        brow[0, ob1:ob1 + n_cv] = b1d
        brow[0, ob2:ob2 + n_cv] = b2d
        brow[0, obmp:obmp + hid] = np.asarray(cnn_fc[1])
        brow[0, obmp + hid:obmp + hid + P] = np.asarray(phase_fc[1])
        brow[0, obh:obh + hid] = np.asarray(hidden_fc[1])
        brow[0, obo:obo + action_space] = np.asarray(out_fc[1])
        brow[0, os1] = s1
        brow[0, os2] = s2

        self._params = (jnp.asarray(wq),
                        jnp.asarray(slab, jnp.bfloat16),
                        jnp.asarray(brow, jnp.float32))
        self._cfg = dict(n_in=n_in, n_conv=n_cv, phase_shape=P, hidden=hid,
                         action_space=action_space, r_p=r_p, r_h=r_h, r_o=r_o,
                         ob1=ob1, ob2=ob2, obmp=obmp, obh=obh, obo=obo,
                         os1=os1, os2=os2)
        self._forward = jax.jit(functools.partial(_forward_impl, cfg=self._cfg))

    def __call__(self, obs, phase, obs_map, edges=None, edges_feature=None):
        # Mirrors the PyTorch forward: obs / edges / edges_feature accepted but unused.
        obs = jnp.asarray(obs, jnp.float32)
        phase = jnp.asarray(phase, jnp.float32)
        obs_map = jnp.asarray(obs_map, jnp.float32)      # [B, n_nodes, 12+4]
        out = self._forward(self._params, phase, obs_map)
        return out, [None]


# ------------------------- pure-JAX f32 reference (check) ------------------------
def _reference_forward(raw, map_shape, phase, obs_map):
    C, H, W = map_shape
    B = obs_map.shape[0]
    x = obs_map.reshape(B, H, W, C)

    def conv3x3(x, w, b):                     # w: [3,3,Cin,Cout], pad=1 stride=1
        xp = jnp.pad(x, ((0, 0), (1, 1), (1, 1), (0, 0)))
        y = jnp.zeros(x.shape[:3] + (w.shape[3],), jnp.float32)
        for dy in range(3):
            for dx in range(3):
                y = y + jnp.einsum("bhwc,co->bhwo",
                                   xp[:, dy:dy + H, dx:dx + W, :], w[dy, dx])
        return y + b

    y = jax.nn.relu(conv3x3(x, *raw["conv1"]))
    y = jax.nn.relu(conv3x3(y, *raw["conv2"]))
    y = y.reshape(B, H * W * 32)
    m = jax.nn.relu(y @ raw["cnn_fc"][0] + raw["cnn_fc"][1])
    p = jax.nn.relu(phase @ raw["phase"][0] + raw["phase"][1])
    h = jax.nn.relu(jnp.concatenate([m, p], axis=1) @ raw["hidden"][0] + raw["hidden"][1])
    return h @ raw["out"][0] + raw["out"][1]


# ----------------------------------- driver --------------------------------------
if __name__ == "__main__":
    root = jax.random.PRNGKey(0)
    k_params, k_obs, k_phase, k_map = jax.random.split(root, 4)

    hidden_size = 32
    obs_length = 12
    phase_shape = 8
    action_space = 4
    C, H, W = 16, 4, 4                 # features = 12+4 = 16, n_nodes = H*W = 16
    map_shape = (C, H, W)
    batch = 2

    net = DQNMapNetPallas(k_params, hidden_size, obs_length, phase_shape, map_shape, action_space)

    obs = jax.random.normal(k_obs, (batch, obs_length), jnp.float32)
    phase = jax.random.normal(k_phase, (batch, phase_shape), jnp.float32)
    obs_map = jax.random.normal(k_map, (batch, H * W, C), jnp.float32)

    out, extra = net(obs, phase, obs_map, edges=None, edges_feature=None)
    jax.block_until_ready(out)
    assert out.shape == (batch, action_space), out.shape
    assert extra == [None]

    # Verify the fused bf16/int8 kernel against the original f32 conv3x3 formulation.
    ref = _reference_forward(net._raw, map_shape, phase, obs_map)
    max_err = float(jnp.max(jnp.abs(out - ref)))
    assert max_err < 5e-2, f"max abs err vs reference: {max_err}"

    # Q-network sanity: greedy action agreement wherever the reference has a clear margin.
    ref_sorted = jnp.sort(ref, axis=1)
    margin = ref_sorted[:, -1] - ref_sorted[:, -2]
    agree = (jnp.argmax(out, axis=1) == jnp.argmax(ref, axis=1)) | (margin < 1e-2)
    assert bool(jnp.all(agree)), "argmax disagreement beyond numeric tolerance"

    print("KERNEL_OK")
</pallas_src>

<mosaic_0001>
module attributes {stable_mosaic.version = 11 : i64} {
  func.func @_dqn_fused_kernel(%arg0: memref<8x256xf32, #tpu.memory_space<vmem>>, %arg1: memref<8x8xf32, #tpu.memory_space<vmem>>, %arg2: memref<768x512xi8, #tpu.memory_space<vmem>>, %arg3: memref<784x128xbf16, #tpu.memory_space<vmem>>, %arg4: memref<1x1664xf32, #tpu.memory_space<vmem>>, %arg5: memref<8x128xf32, #tpu.memory_space<vmem>>) attributes {dimension_semantics = [], scalar_prefetch = 0 : i64, scratch_operands = 0 : i64, tpu.core_type = #tpu.core_type<tc>} {
    %c0 = arith.constant 0 : index
    %c0_0 = arith.constant 0 : index
    %0 = vector.load %arg2[%c0, %c0_0] : memref<768x512xi8, #tpu.memory_space<vmem>>, vector<256x512xi8>
    %1 = arith.sitofp %0 : vector<256x512xi8> to vector<256x512xf32>
    %2 = arith.truncf %1 : vector<256x512xf32> to vector<256x512xbf16>
    %c256 = arith.constant 256 : index
    %c0_1 = arith.constant 0 : index
    %3 = vector.load %arg2[%c256, %c0_1] : memref<768x512xi8, #tpu.memory_space<vmem>>, vector<512x512xi8>
    %4 = arith.sitofp %3 : vector<512x512xi8> to vector<512x512xf32>
    %5 = arith.truncf %4 : vector<512x512xf32> to vector<512x512xbf16>
    %c0_2 = arith.constant 0 : index
    %c1408 = arith.constant 1408 : index
    %6 = vector.load %arg4[%c0_2, %c1408] : memref<1x1664xf32, #tpu.memory_space<vmem>>, vector<1x1xf32>
    %c0_3 = arith.constant 0 : index
    %c1536 = arith.constant 1536 : index
    %7 = vector.load %arg4[%c0_3, %c1536] : memref<1x1664xf32, #tpu.memory_space<vmem>>, vector<1x1xf32>
    %c0_4 = arith.constant 0 : index
    %c0_5 = arith.constant 0 : index
    %8 = vector.load %arg0[%c0_4, %c0_5] : memref<8x256xf32, #tpu.memory_space<vmem>>, vector<8x256xf32>
    %9 = arith.truncf %8 : vector<8x256xf32> to vector<8x256xbf16>
    %cst = arith.constant dense<0.000000e+00> : vector<8x512xf32>
    %10 = tpu.matmul %9, %2, %cst {dimension_numbers = #tpu.dot_dimension_numbers<[1], [0], [0], [1], [0, 0, 1, 1], [], []>} : vector<8x256xbf16>, vector<256x512xbf16>, vector<8x512xf32> -> vector<8x512xf32>
    %11 = vector.broadcast %6 : vector<1x1xf32> to vector<8x512xf32>
    %12 = arith.mulf %10, %11 : vector<8x512xf32>
    %c0_6 = arith.constant 0 : index
    %c0_7 = arith.constant 0 : index
    %13 = vector.load %arg4[%c0_6, %c0_7] : memref<1x1664xf32, #tpu.memory_space<vmem>>, vector<1x512xf32>
    %14 = vector.broadcast %13 : vector<1x512xf32> to vector<8x512xf32>
    %15 = arith.addf %12, %14 : vector<8x512xf32>
    %cst_8 = arith.constant 0.000000e+00 : f32
    %16 = vector.broadcast %cst_8 : f32 to vector<8x512xf32>
    %17 = arith.maximumf %15, %16 : vector<8x512xf32>
    %18 = arith.truncf %17 : vector<8x512xf32> to vector<8x512xbf16>
    %cst_9 = arith.constant dense<0.000000e+00> : vector<8x512xf32>
    %19 = tpu.matmul %18, %5, %cst_9 {dimension_numbers = #tpu.dot_dimension_numbers<[1], [0], [0], [1], [0, 0, 1, 1], [], []>} : vector<8x512xbf16>, vector<512x512xbf16>, vector<8x512xf32> -> vector<8x512xf32>
    %20 = vector.broadcast %7 : vector<1x1xf32> to vector<8x512xf32>
    %21 = arith.mulf %19, %20 : vector<8x512xf32>
    %c0_10 = arith.constant 0 : index
    %c512 = arith.constant 512 : index
    %22 = vector.load %arg4[%c0_10, %c512] : memref<1x1664xf32, #tpu.memory_space<vmem>>, vector<1x512xf32>
    %23 = vector.broadcast %22 : vector<1x512xf32> to vector<8x512xf32>
    %24 = arith.addf %21, %23 : vector<8x512xf32>
    %cst_11 = arith.constant 0.000000e+00 : f32
    %25 = vector.broadcast %cst_11 : f32 to vector<8x512xf32>
    %26 = arith.maximumf %24, %25 : vector<8x512xf32>
    %27 = arith.truncf %26 : vector<8x512xf32> to vector<8x512xbf16>
    %c0_12 = arith.constant 0 : index
    %c0_13 = arith.constant 0 : index
    %28 = vector.load %arg3[%c0_12, %c0_13] : memref<784x128xbf16, #tpu.memory_space<vmem>>, vector<512x128xbf16>
    %cst_14 = arith.constant dense<0.000000e+00> : vector<8x128xf32>
    %29 = tpu.matmul %27, %28, %cst_14 {dimension_numbers = #tpu.dot_dimension_numbers<[1], [0], [0], [1], [0, 0, 1, 1], [], []>} : vector<8x512xbf16>, vector<512x128xbf16>, vector<8x128xf32> -> vector<8x128xf32>
    %c0_15 = arith.constant 0 : index
    %c0_16 = arith.constant 0 : index
    %30 = vector.load %arg1[%c0_15, %c0_16] : memref<8x8xf32, #tpu.memory_space<vmem>>, vector<8x8xf32>
    %31 = arith.truncf %30 : vector<8x8xf32> to vector<8x8xbf16>
    %c512_17 = arith.constant 512 : index
    %c0_18 = arith.constant 0 : index
    %32 = vector.load %arg3[%c512_17, %c0_18] : memref<784x128xbf16, #tpu.memory_space<vmem>>, vector<8x128xbf16>
    %cst_19 = arith.constant dense<0.000000e+00> : vector<8x128xf32>
    %33 = tpu.matmul %31, %32, %cst_19 {dimension_numbers = #tpu.dot_dimension_numbers<[1], [0], [0], [1], [0, 0, 1, 1], [], []>} : vector<8x8xbf16>, vector<8x128xbf16>, vector<8x128xf32> -> vector<8x128xf32>
    %34 = arith.addf %29, %33 : vector<8x128xf32>
    %c0_20 = arith.constant 0 : index
    %c1024 = arith.constant 1024 : index
    %35 = vector.load %arg4[%c0_20, %c1024] : memref<1x1664xf32, #tpu.memory_space<vmem>>, vector<1x128xf32>
    %36 = vector.broadcast %35 : vector<1x128xf32> to vector<8x128xf32>
    %37 = arith.addf %34, %36 : vector<8x128xf32>
    %cst_21 = arith.constant 0.000000e+00 : f32
    %38 = vector.broadcast %cst_21 : f32 to vector<8x128xf32>
    %39 = arith.maximumf %37, %38 : vector<8x128xf32>
    %40 = arith.truncf %39 : vector<8x128xf32> to vector<8x128xbf16>
    %c528 = arith.constant 528 : index
    %c0_22 = arith.constant 0 : index
    %41 = vector.load %arg3[%c528, %c0_22] : memref<784x128xbf16, #tpu.memory_space<vmem>>, vector<128x128xbf16>
    %cst_23 = arith.constant dense<0.000000e+00> : vector<8x128xf32>
    %42 = tpu.matmul %40, %41, %cst_23 {dimension_numbers = #tpu.dot_dimension_numbers<[1], [0], [0], [1], [0, 0, 1, 1], [], []>} : vector<8x128xbf16>, vector<128x128xbf16>, vector<8x128xf32> -> vector<8x128xf32>
    %c0_24 = arith.constant 0 : index
    %c1152 = arith.constant 1152 : index
    %43 = vector.load %arg4[%c0_24, %c1152] : memref<1x1664xf32, #tpu.memory_space<vmem>>, vector<1x128xf32>
    %44 = vector.broadcast %43 : vector<1x128xf32> to vector<8x128xf32>
    %45 = arith.addf %42, %44 : vector<8x128xf32>
    %cst_25 = arith.constant 0.000000e+00 : f32
    %46 = vector.broadcast %cst_25 : f32 to vector<8x128xf32>
    %47 = arith.maximumf %45, %46 : vector<8x128xf32>
    %48 = arith.truncf %47 : vector<8x128xf32> to vector<8x128xbf16>
    %c656 = arith.constant 656 : index
    %c0_26 = arith.constant 0 : index
    %49 = vector.load %arg3[%c656, %c0_26] : memref<784x128xbf16, #tpu.memory_space<vmem>>, vector<128x128xbf16>
    %cst_27 = arith.constant dense<0.000000e+00> : vector<8x128xf32>
    %50 = tpu.matmul %48, %49, %cst_27 {dimension_numbers = #tpu.dot_dimension_numbers<[1], [0], [0], [1], [0, 0, 1, 1], [], []>} : vector<8x128xbf16>, vector<128x128xbf16>, vector<8x128xf32> -> vector<8x128xf32>
    %c0_28 = arith.constant 0 : index
    %c1280 = arith.constant 1280 : index
    %51 = vector.load %arg4[%c0_28, %c1280] : memref<1x1664xf32, #tpu.memory_space<vmem>>, vector<1x128xf32>
    %52 = vector.broadcast %51 : vector<1x128xf32> to vector<8x128xf32>
    %53 = arith.addf %50, %52 : vector<8x128xf32>
    %c0_29 = arith.constant 0 : index
    %c0_30 = arith.constant 0 : index
    %54 = vector.load %arg5[%c0_29, %c0_30] : memref<8x128xf32, #tpu.memory_space<vmem>>, vector<8x128xf32>
    tpu.vector_store %arg5[%c0_29, %c0_30], %53 {strides = array<i32>} : memref<8x128xf32, #tpu.memory_space<vmem>>, vector<8x128xf32>,
    return
  }
}

</mosaic_0001>

<bundles_post_ra>
// kernel: _forward_impl.1
= control target key start
LH: loop header
LB: loop body
LE: loop exit
PB: predicated region body
PF: predicated region fallthrough
CT: control target
= control target key end

     0   :  { %10 = vsyncpa [#allocation3], 0  ;;  %s1744_s0 = inlined_call_operand.vmem [shape: f32[8,256], index: 0, kind: input, shape index: {}]   ;;  %s1745_s1 = inlined_call_operand.vmem [shape: f32[8,8], index: 1, kind: input, shape index: {}]   ;;  %s1746_s2 = inlined_call_operand.hbm [shape: s8[768,512], index: 2, kind: input, shape index: {}]   ;;  %s1747_s3 = inlined_call_operand.hbm [shape: bf16[784,128], index: 3, kind: input, shape index: {}]   ;;  %s1748_s4 = inlined_call_operand.vmem [shape: f32[1,1664], index: 4, kind: input, shape index: {}]   ;;  %s1749_s5 = inlined_call_operand.vmem [shape: f32[8,128], index: 5, kind: output, shape index: {}]  }
   0x1   :  { %11 = vsyncpa [#allocation5], 0  ;;  %s1589_s18 = smov [#allocation2]   ;;  %s1541_s22 = scalar_lea.hbm %s1746_s2, 12288 }
   0x2   :  { %s21_s19 = sshll.u32 %s1589_s18, 4  ;;  %p1542_p0 = scmp.ne.s32.totalorder %s1746_s2, %s1541_s22  ;;  %s22_s19 = int_to_ptr.vmem [resolvable:$true] %s21_s19 }
   0x3   :  { %p1545_p1 = scmp.lt.u32.totalorder %s1541_s22, %s1746_s2 }
   0x5   :  { %p1547_p2 = pnand %p1545_p1, %p1542_p0 }
   0x7   :  { %1550 = shalt.err (!%p1547_p2)
}
   0x8   :  { %s1551_s27 = scalar_lea.vmem %s22_s19, 12288  ;;  %p1556_p4 = scmp.lt.s32.totalorder %s22_s19, %s22_s19 }
   0x9   :  { %p1552_p3 = scmp.ne.s32.totalorder %s22_s19, %s1551_s27  ;;  %p1557_p5 = scmp.lt.s32.totalorder %s1551_s27, %s1551_s27 }
   0xb   :  { %p1558_p6 = por %p1557_p5, %p1556_p4 }
   0xd   :  { %p1559_p7 = pnand %p1558_p6, %p1552_p3 }
   0xf   :  { %1562 = shalt.err (!%p1559_p7)
}
  0x10   :  { %s1590_s28 = smov 512   ;;  %s1591_s29 = smov 32  }
  0x11   :  { %27 = dma.hbm_to_vmem [thread:$0]  %s1746_s2, 12288, %s22_s19, [#allocation3], %s1590_s28, %s1590_s28, %s1591_s29  }
  0x12   :  { %s1592_s7 = smov [#allocation4]   ;;  %s1563_s11 = scalar_lea.hbm %s1747_s3, 6272 }
  0x13   :  { %s33_s8 = sshll.u32 %s1592_s7, 4  ;;  %p1564_p8 = scmp.ne.s32.totalorder %s1747_s3, %s1563_s11  ;;  %s34_s8 = int_to_ptr.vmem [resolvable:$true] %s33_s8 }
  0x14   :  { %p1567_p9 = scmp.lt.u32.totalorder %s1563_s11, %s1747_s3 }
  0x16   :  { %p1569_p10 = pnand %p1567_p9, %p1564_p8 }
  0x18   :  { %1572 = shalt.err (!%p1569_p10)
}
  0x19   :  { %s1573_s16 = scalar_lea.vmem %s34_s8, 6272  ;;  %p1578_p12 = scmp.lt.s32.totalorder %s34_s8, %s34_s8 }
  0x1a   :  { %p1574_p11 = scmp.ne.s32.totalorder %s34_s8, %s1573_s16  ;;  %p1579_p13 = scmp.lt.s32.totalorder %s1573_s16, %s1573_s16 }
  0x1c   :  { %p1580_p0 = por %p1579_p13, %p1578_p12 }
  0x1e   :  { %p1581_p1 = pnand %p1580_p0, %p1574_p11 }
  0x20   :  { %1584 = shalt.err (!%p1581_p1)
}
  0x21   :  { %s1593_s2 = smov 64   ;;  %s1594_s17 = smov 4  }
  0x22   :  { %39 = dma.hbm_to_vmem [thread:$0]  %s1747_s3, 6272, %s34_s8, [#allocation5], %s1593_s2, %s1593_s2, %s1594_s17  }
  0x23   :  { %1585 = dma.done.wait [#allocation3], 12288  }
  0x24   :  { %1586 = vsyncadd [#allocation3], 4294955008 }
  0x25   :  { %1587 = dma.done.wait [#allocation5], 6272  }
  0x26   :  { %1588 = vsyncadd [#allocation5], 4294961024  ;;  %v1595_v0 = vmov 0   ;;  %v50_v1 = vld [vmem:[#allocation2 + $0x8] sm:$0xff]  ;;  %v52_v2 = vld [vmem:[#allocation2 + $0x18] sm:$0xff]  ;;  %vm754_vm0 = vcmask 1043456  }
  0x27   :  { %1492 = vset.pattern.permute.xlu0 %v1595_v0  ;;  %v49_v3 = vld [vmem:[#allocation2] sm:$0xff]  ;;  %v82_v4 = vunpack.c.l.s8.bf16 %v50_v1  ;;  %v86_v5 = vunpack.c.h.s8.bf16 %v50_v1  ;;  %v84_v6 = vunpack.c.l.s8.bf16 %v52_v2  ;;  %v88_v7 = vunpack.c.h.s8.bf16 %v52_v2  ;;  %v51_v8 = vld [vmem:[#allocation2 + $0x10] sm:$0xff]  ;;  %v54_v11 = vld [vmem:[#allocation2 + $0x28] sm:$0xff] }
  0x28   :  { %v81_v9 = vunpack.c.l.s8.bf16 %v49_v3  ;;  %v83_v10 = vunpack.c.l.s8.bf16 %v51_v8  ;;  %v56_v12 = vld [vmem:[#allocation2 + $0x38] sm:$0xff]  ;;  %v85_v13 = vunpack.c.h.s8.bf16 %v49_v3  ;;  %v87_v14 = vunpack.c.h.s8.bf16 %v51_v8  ;;  %v53_v17 = vld [vmem:[#allocation2 + $0x20] sm:$0xff]  ;;  %v55_v18 = vld [vmem:[#allocation2 + $0x30] sm:$0xff] }
  0x29   :  { %343 = vmatprep.subr.bf16.mxu0 %v82_v4  ;;  %384 = vmatprep.subr.bf16.mxu1 %v84_v6  ;;  %v90_v15 = vunpack.c.l.s8.bf16 %v54_v11  ;;  %v92_v16 = vunpack.c.l.s8.bf16 %v56_v12  ;;  %v89_v19 = vunpack.c.l.s8.bf16 %v53_v17  ;;  %v91_v20 = vunpack.c.l.s8.bf16 %v55_v18  ;;  %v58_v23 = vld [vmem:[#allocation2 + $0x48] sm:$0xff]  ;;  %v60_v24 = vld [vmem:[#allocation2 + $0x58] sm:$0xff]  ;;  %v57_v30 = vld [vmem:[#allocation2 + $0x40] sm:$0xff] }
  0x2a   :  { %344 = vmatpush1.bf16.msra.mxu0 %v81_v9  ;;  %385 = vmatpush1.bf16.msra.mxu1 %v83_v10  ;;  %v94_v21 = vunpack.c.h.s8.bf16 %v54_v11  ;;  %v96_v22 = vunpack.c.h.s8.bf16 %v56_v12  ;;  %v1311_v25 = vld [vmem:[%s1748_s4 + $0xb] ss:$0 sm:$0xff]  ;;  %v93_v26 = vunpack.c.h.s8.bf16 %v53_v17  ;;  %v95_v27 = vunpack.c.h.s8.bf16 %v55_v18  ;;  %v59_v31 = vld [vmem:[#allocation2 + $0x50] sm:$0xff]  ;;  %v1312_v33 = vld [vmem:[%s1748_s4 + $0xc] ss:$0 sm:$0xff] }
  0x2b   :  { %345 = vmatprep.subr.bf16.mxu0 %v86_v5  ;;  %386 = vmatprep.subr.bf16.mxu1 %v88_v7  ;;  %v98_v28 = vunpack.c.l.s8.bf16 %v58_v23  ;;  %v100_v29 = vunpack.c.l.s8.bf16 %v60_v24  ;;  %v340_v32 = vld [vmem:[%s1744_s0 + $0x8] sm:$0xff]  ;;  %v97_v34 = vunpack.c.l.s8.bf16 %v57_v30  ;;  %v99_v35 = vunpack.c.l.s8.bf16 %v59_v31  ;;  %v64_v40 = vld [vmem:[#allocation2 + $0x78] sm:$0xff]  ;;  %v61_v43 = vld [vmem:[#allocation2 + $0x60] sm:$0xff] }
  0x2c   :  { %431 = vperm.xlu0 %1492, %v1311_v25   ;;  %v102_v36 = vunpack.c.h.s8.bf16 %v58_v23  ;;  %v104_v37 = vunpack.c.h.s8.bf16 %v60_v24  ;;  %v342_v38 = vpack.c.bf16 %v340_v32, %v340_v32  ;;  %v62_v39 = vld [vmem:[#allocation2 + $0x68] sm:$0xff]  ;;  %v101_v41 = vunpack.c.h.s8.bf16 %v57_v30  ;;  %v63_v46 = vld [vmem:[#allocation2 + $0x70] sm:$0xff]  ;;  %v68_v50 = vld [vmem:[#allocation2 + $0x98] sm:$0xff] }
  0x2d   :  { %v103_v42 = vunpack.c.h.s8.bf16 %v59_v31  ;;  %v106_v44 = vunpack.c.l.s8.bf16 %v62_v39  ;;  %v108_v45 = vunpack.c.l.s8.bf16 %v64_v40  ;;  %v105_v47 = vunpack.c.l.s8.bf16 %v61_v43  ;;  %v66_v49 = vld [vmem:[#allocation2 + $0x88] sm:$0xff]  ;;  %v65_v53 = vld [vmem:[#allocation2 + $0x80] sm:$0xff]  ;;  %v67_v54 = vld [vmem:[#allocation2 + $0x90] sm:$0xff] }
  0x2e   :  { %346 = vmatpush1.bf16.msra.mxu0 %v85_v13  ;;  %387 = vmatpush1.bf16.msra.mxu1 %v87_v14  ;;  %v107_v48 = vunpack.c.l.s8.bf16 %v63_v46  ;;  %v110_v51 = vunpack.c.h.s8.bf16 %v62_v39  ;;  %v112_v52 = vunpack.c.h.s8.bf16 %v64_v40  ;;  %v109_v55 = vunpack.c.h.s8.bf16 %v61_v43  ;;  %v70_v61 = vld [vmem:[#allocation2 + $0xa8] sm:$0xff]  ;;  %v72_v62 = vld [vmem:[#allocation2 + $0xb8] sm:$0xff]  ;;  %v69_v1 = vld [vmem:[#allocation2 + $0xa0] sm:$0xff] }
  0x2f   :  { %347 = vmatprep.subr.bf16.mxu0 %v90_v15  ;;  %388 = vmatprep.subr.bf16.mxu1 %v92_v16  ;;  %v111_v56 = vunpack.c.h.s8.bf16 %v63_v46  ;;  %v114_v57 = vunpack.c.l.s8.bf16 %v66_v49  ;;  %v116_v58 = vunpack.c.l.s8.bf16 %v68_v50  ;;  %v113_v59 = vunpack.c.l.s8.bf16 %v65_v53  ;;  %v71_v2 = vld [vmem:[#allocation2 + $0xb0] sm:$0xff]  ;;  %v74_v9 = vld [vmem:[#allocation2 + $0xc8] sm:$0xff]  ;;  %v76_v10 = vld [vmem:[#allocation2 + $0xd8] sm:$0xff] }
  0x30   :  { %642 = vperm.xlu0 %1492, %v1312_v33   ;;  %375 = vmatprep.mubr.bf16.mxu0 %v342_v38  ;;  %v115_v60 = vunpack.c.l.s8.bf16 %v67_v54  ;;  %v118_v63 = vunpack.c.h.s8.bf16 %v66_v49  ;;  %v120_v0 = vunpack.c.h.s8.bf16 %v68_v50  ;;  %v117_v3 = vunpack.c.h.s8.bf16 %v65_v53  ;;  %v73_v13 = vld [vmem:[#allocation2 + $0xc0] sm:$0xff]  ;;  %v75_v14 = vld [vmem:[#allocation2 + $0xd0] sm:$0xff]  ;;  %v150_v49 = vld [vmem:[#allocation2 + $0x128] sm:$0xff] }
  0x31   :  { %416 = vmatprep.mubr.bf16.mxu1 %v342_v38  ;;  %v119_v4 = vunpack.c.h.s8.bf16 %v67_v54  ;;  %v122_v5 = vunpack.c.l.s8.bf16 %v70_v61  ;;  %v124_v6 = vunpack.c.l.s8.bf16 %v72_v62  ;;  %v121_v7 = vunpack.c.l.s8.bf16 %v69_v1  ;;  %v79_v30 = vld [vmem:[#allocation2 + $0xf0] sm:$0xff]  ;;  %v339_v39 = vld [vmem:[%s1744_s0] sm:$0xff]  ;;  %v152_v50 = vld [vmem:[#allocation2 + $0x138] sm:$0xff] }
  0x32   :  { %348 = vmatpush1.bf16.msra.mxu0 %v89_v19  ;;  %389 = vmatpush1.bf16.msra.mxu1 %v91_v20  ;;  %v123_v8 = vunpack.c.l.s8.bf16 %v71_v2  ;;  %v126_v11 = vunpack.c.h.s8.bf16 %v70_v61  ;;  %v128_v12 = vunpack.c.h.s8.bf16 %v72_v62  ;;  %v125_v15 = vunpack.c.h.s8.bf16 %v69_v1  ;;  %v147_v43 = vld [vmem:[#allocation2 + $0x110] sm:$0xff]  ;;  %v154_v61 = vld [vmem:[#allocation2 + $0x148] sm:$0xff]  ;;  %v156_v62 = vld [vmem:[#allocation2 + $0x158] sm:$0xff] }
  0x33   :  { %349 = vmatprep.subr.bf16.mxu0 %v94_v21  ;;  %390 = vmatprep.subr.bf16.mxu1 %v96_v22  ;;  %v127_v16 = vunpack.c.h.s8.bf16 %v71_v2  ;;  %v130_v17 = vunpack.c.l.s8.bf16 %v74_v9  ;;  %v132_v18 = vunpack.c.l.s8.bf16 %v76_v10  ;;  %v129_v19 = vunpack.c.l.s8.bf16 %v73_v13  ;;  %v78_v21 = vld [vmem:[#allocation2 + $0xe8] sm:$0xff]  ;;  %v80_v22 = vld [vmem:[#allocation2 + $0xf8] sm:$0xff] }
  0x34   :  { %v131_v20 = vunpack.c.l.s8.bf16 %v75_v14  ;;  %v134_v23 = vunpack.c.h.s8.bf16 %v74_v9  ;;  %v136_v24 = vunpack.c.h.s8.bf16 %v76_v10  ;;  %v133_v25 = vunpack.c.h.s8.bf16 %v73_v13  ;;  %v158_v9 = vld [vmem:[#allocation2 + $0x168] sm:$0xff]  ;;  %v160_v10 = vld [vmem:[#allocation2 + $0x178] sm:$0xff] }
  0x35   :  { %v139_v32 = vunpack.c.l.s8.bf16 %v79_v30  ;;  %v142_v33 = vunpack.c.h.s8.bf16 %v78_v21  ;;  %v143_v38 = vunpack.c.h.s8.bf16 %v79_v30  ;;  %v211_v46 = vunpack.c.l.s8.bf16 %v147_v43 }
  0x36   :  { %350 = vmatpush1.bf16.msra.mxu0 %v93_v26  ;;  %391 = vmatpush1.bf16.msra.mxu1 %v95_v27  ;;  %v135_v26 = vunpack.c.h.s8.bf16 %v75_v14  ;;  %v138_v27 = vunpack.c.l.s8.bf16 %v78_v21  ;;  %v218_v53 = vunpack.c.l.s8.bf16 %v150_v49  ;;  %v220_v54 = vunpack.c.l.s8.bf16 %v152_v50  ;;  %v162_v21 = vld [vmem:[#allocation2 + $0x188] sm:$0xff] }
  0x37   :  { %351 = vmatprep.subr.bf16.mxu0 %v98_v28  ;;  %392 = vmatprep.subr.bf16.mxu1 %v100_v29  ;;  %v140_v28 = vunpack.c.l.s8.bf16 %v80_v22  ;;  %v77_v29 = vld [vmem:[#allocation2 + $0xe0] sm:$0xff]  ;;  %v226_v1 = vunpack.c.l.s8.bf16 %v154_v61  ;;  %v228_v2 = vunpack.c.l.s8.bf16 %v156_v62  ;;  %v234_v13 = vunpack.c.l.s8.bf16 %v158_v9 }
  0x38   :  { %v137_v31 = vunpack.c.l.s8.bf16 %v77_v29  ;;  %v236_v14 = vunpack.c.l.s8.bf16 %v160_v10  ;;  %vm1597_vm1 = vmmov 0   ;;  %vm750_vm2 = vcmask 64512  }
  0x3a   :  { %352 = vmatpush1.bf16.msra.mxu0 %v97_v34  ;;  %393 = vmatpush1.bf16.msra.mxu1 %v99_v35  ;;  %v144_v34 = vunpack.c.h.s8.bf16 %v80_v22  ;;  %v146_v35 = vld [vmem:[#allocation2 + $0x108] sm:$0xff]  ;;  %v164_v22 = vld [vmem:[#allocation2 + $0x198] sm:$0xff] }
  0x3b   :  { %353 = vmatprep.subr.bf16.mxu0 %v102_v36  ;;  %394 = vmatprep.subr.bf16.mxu1 %v104_v37  ;;  %v148_v36 = vld [vmem:[#allocation2 + $0x118] sm:$0xff]  ;;  %v141_v37 = vunpack.c.h.s8.bf16 %v77_v29  ;;  %v210_v40 = vunpack.c.l.s8.bf16 %v146_v35 }
  0x3e   :  { %354 = vmatpush1.bf16.msra.mxu0 %v101_v41  ;;  %395 = vmatpush1.bf16.msra.mxu1 %v103_v42  ;;  %v212_v41 = vunpack.c.l.s8.bf16 %v148_v36  ;;  %v145_v42 = vld [vmem:[#allocation2 + $0x100] sm:$0xff] }
  0x3f   :  { %355 = vmatprep.subr.bf16.mxu0 %v106_v44  ;;  %396 = vmatprep.subr.bf16.mxu1 %v108_v45  ;;  %v341_v44 = vpack.c.bf16 %v339_v39, %v339_v39  ;;  %v209_v45 = vunpack.c.l.s8.bf16 %v145_v42  ;;  %v165_v39 = vld [vmem:[#allocation2 + $0x1a0] sm:$0xff] }
  0x42   :  { %356 = vmatpush1.bf16.msra.mxu0 %v105_v47  ;;  %397 = vmatpush1.bf16.msra.mxu1 %v107_v48  ;;  %v214_v47 = vunpack.c.h.s8.bf16 %v146_v35  ;;  %v216_v48 = vunpack.c.h.s8.bf16 %v148_v36 }
  0x43   :  { %357 = vmatprep.subr.bf16.mxu0 %v110_v51  ;;  %398 = vmatprep.subr.bf16.mxu1 %v112_v52  ;;  %v213_v51 = vunpack.c.h.s8.bf16 %v145_v42  ;;  %v215_v52 = vunpack.c.h.s8.bf16 %v147_v43 }
  0x46   :  { %358 = vmatpush1.bf16.msra.mxu0 %v109_v55  ;;  %399 = vmatpush1.bf16.msra.mxu1 %v111_v56  ;;  %v149_v55 = vld [vmem:[#allocation2 + $0x120] sm:$0xff]  ;;  %v151_v56 = vld [vmem:[#allocation2 + $0x130] sm:$0xff] }
  0x47   :  { %359 = vmatprep.subr.bf16.mxu0 %v114_v57  ;;  %400 = vmatprep.subr.bf16.mxu1 %v116_v58  ;;  %v217_v57 = vunpack.c.l.s8.bf16 %v149_v55  ;;  %v219_v58 = vunpack.c.l.s8.bf16 %v151_v56 }
  0x4a   :  { %360 = vmatpush1.bf16.msra.mxu0 %v113_v59  ;;  %401 = vmatpush1.bf16.msra.mxu1 %v115_v60  ;;  %v222_v59 = vunpack.c.h.s8.bf16 %v150_v49  ;;  %v224_v60 = vunpack.c.h.s8.bf16 %v152_v50 }
  0x4b   :  { %361 = vmatprep.subr.bf16.mxu0 %v118_v63  ;;  %402 = vmatprep.subr.bf16.mxu1 %v120_v0  ;;  %v221_v63 = vunpack.c.h.s8.bf16 %v149_v55  ;;  %v223_v0 = vunpack.c.h.s8.bf16 %v151_v56 }
  0x4e   :  { %362 = vmatpush1.bf16.msra.mxu0 %v117_v3  ;;  %403 = vmatpush1.bf16.msra.mxu1 %v119_v4  ;;  %v153_v3 = vld [vmem:[#allocation2 + $0x140] sm:$0xff]  ;;  %v155_v4 = vld [vmem:[#allocation2 + $0x150] sm:$0xff] }
  0x4f   :  { %363 = vmatprep.subr.bf16.mxu0 %v122_v5  ;;  %404 = vmatprep.subr.bf16.mxu1 %v124_v6  ;;  %v225_v5 = vunpack.c.l.s8.bf16 %v153_v3  ;;  %v227_v6 = vunpack.c.l.s8.bf16 %v155_v4 }
  0x52   :  { %364 = vmatpush1.bf16.msra.mxu0 %v121_v7  ;;  %405 = vmatpush1.bf16.msra.mxu1 %v123_v8  ;;  %v230_v7 = vunpack.c.h.s8.bf16 %v154_v61  ;;  %v232_v8 = vunpack.c.h.s8.bf16 %v156_v62  ;;  %v173_v62 = vld [vmem:[#allocation2 + $0x1e0] sm:$0xff] }
  0x53   :  { %365 = vmatprep.subr.bf16.mxu0 %v126_v11  ;;  %406 = vmatprep.subr.bf16.mxu1 %v128_v12  ;;  %v229_v11 = vunpack.c.h.s8.bf16 %v153_v3  ;;  %v231_v12 = vunpack.c.h.s8.bf16 %v155_v4 }
  0x56   :  { %366 = vmatpush1.bf16.msra.mxu0 %v125_v15  ;;  %407 = vmatpush1.bf16.msra.mxu1 %v127_v16  ;;  %v157_v15 = vld [vmem:[#allocation2 + $0x160] sm:$0xff]  ;;  %v159_v16 = vld [vmem:[#allocation2 + $0x170] sm:$0xff] }
  0x57   :  { %367 = vmatprep.subr.bf16.mxu0 %v130_v17  ;;  %408 = vmatprep.subr.bf16.mxu1 %v132_v18  ;;  %v233_v17 = vunpack.c.l.s8.bf16 %v157_v15  ;;  %v235_v18 = vunpack.c.l.s8.bf16 %v159_v16 }
  0x5a   :  { %368 = vmatpush1.bf16.msra.mxu0 %v129_v19  ;;  %409 = vmatpush1.bf16.msra.mxu1 %v131_v20  ;;  %v238_v19 = vunpack.c.h.s8.bf16 %v158_v9  ;;  %v240_v20 = vunpack.c.h.s8.bf16 %v160_v10 }
  0x5b   :  { %369 = vmatprep.subr.bf16.mxu0 %v134_v23  ;;  %410 = vmatprep.subr.bf16.mxu1 %v136_v24  ;;  %v237_v23 = vunpack.c.h.s8.bf16 %v157_v15  ;;  %v239_v24 = vunpack.c.h.s8.bf16 %v159_v16  ;;  %v438_v15 = vld [vmem:[%s1748_s4] sm:$0xf] }
  0x5e   :  { %370 = vmatpush1.bf16.msra.mxu0 %v133_v25  ;;  %411 = vmatpush1.bf16.msra.mxu1 %v135_v26  ;;  %v242_v25 = vunpack.c.l.s8.bf16 %v162_v21  ;;  %v244_v26 = vunpack.c.l.s8.bf16 %v164_v22 }
  0x5f   :  { %371 = vmatprep.subr.bf16.mxu0 %v138_v27  ;;  %412 = vmatprep.subr.bf16.mxu1 %v140_v28  ;;  %v161_v27 = vld [vmem:[#allocation2 + $0x180] sm:$0xff]  ;;  %v163_v28 = vld [vmem:[#allocation2 + $0x190] sm:$0xff] }
  0x60   :  { %v241_v29 = vunpack.c.l.s8.bf16 %v161_v27  ;;  %v243_v30 = vunpack.c.l.s8.bf16 %v163_v28  ;;  %v245_v35 = vunpack.c.h.s8.bf16 %v161_v27  ;;  %v247_v36 = vunpack.c.h.s8.bf16 %v163_v28 }
  0x62   :  { %372 = vmatpush1.bf16.msra.mxu0 %v137_v31  ;;  %413 = vmatpush1.bf16.msra.mxu1 %v139_v32  ;;  %v246_v31 = vunpack.c.h.s8.bf16 %v162_v21  ;;  %v248_v32 = vunpack.c.h.s8.bf16 %v164_v22 }
  0x63   :  { %373 = vmatprep.subr.bf16.mxu0 %v142_v33  ;;  %414 = vmatprep.subr.bf16.mxu1 %v144_v34  ;;  %v166_v33 = vld [vmem:[#allocation2 + $0x1a8] sm:$0xff]  ;;  %v168_v34 = vld [vmem:[#allocation2 + $0x1b8] sm:$0xff] }
  0x64   :  { %v254_v43 = vunpack.c.h.s8.bf16 %v166_v33 }
  0x66   :  { %374 = vmatpush1.bf16.msra.mxu0 %v141_v37  ;;  %415 = vmatpush1.bf16.msra.mxu1 %v143_v38  ;;  %v250_v37 = vunpack.c.l.s8.bf16 %v166_v33  ;;  %v252_v38 = vunpack.c.l.s8.bf16 %v168_v34 }
  0x67   :  { %472 = vmatprep.subr.bf16.mxu0 %v210_v40  ;;  %554 = vmatprep.subr.bf16.mxu1 %v212_v41  ;;  %v167_v40 = vld [vmem:[#allocation2 + $0x1b0] sm:$0xff]  ;;  %v249_v41 = vunpack.c.l.s8.bf16 %v165_v39 }
  0x68   :  { %v251_v42 = vunpack.c.l.s8.bf16 %v167_v40 }
  0x69   :  { %376 = vmatmul.mubr.bf16.vlgmr.msra.gmra.mrb[0].mxu0 %v341_v44  ;;  %417 = vmatmul.mubr.bf16.vlgmr.msra.gmra.mrb[0].mxu1 %v341_v44  ;;  %v256_v44 = vunpack.c.h.s8.bf16 %v168_v34 }
  0x6a   :  { %473 = vmatpush1.bf16.msra.mxu0 %v209_v45  ;;  %555 = vmatpush1.bf16.msra.mxu1 %v211_v46  ;;  %v170_v45 = vld [vmem:[#allocation2 + $0x1c8] sm:$0xff]  ;;  %v172_v46 = vld [vmem:[#allocation2 + $0x1d8] sm:$0xff] }
  0x6b   :  { %474 = vmatprep.subr.bf16.mxu0 %v214_v47  ;;  %556 = vmatprep.subr.bf16.mxu1 %v216_v48  ;;  %v253_v47 = vunpack.c.h.s8.bf16 %v165_v39  ;;  %v255_v48 = vunpack.c.h.s8.bf16 %v167_v40  ;;  %v258_v49 = vunpack.c.l.s8.bf16 %v170_v45  ;;  %v260_v50 = vunpack.c.l.s8.bf16 %v172_v46  ;;  %v177_v40 = vld [vmem:[#allocation2 + $0x200] sm:$0xff] }
  0x6c   :  { %v262_v55 = vunpack.c.h.s8.bf16 %v170_v45  ;;  %v264_v56 = vunpack.c.h.s8.bf16 %v172_v46  ;;  %v273_v45 = vunpack.c.l.s8.bf16 %v177_v40 }
  0x6e   :  { %475 = vmatpush1.bf16.msra.mxu0 %v213_v51  ;;  %557 = vmatpush1.bf16.msra.mxu1 %v215_v52  ;;  %v169_v51 = vld [vmem:[#allocation2 + $0x1c0] sm:$0xff]  ;;  %v171_v52 = vld [vmem:[#allocation2 + $0x1d0] sm:$0xff] }
  0x6f   :  { %476 = vmatprep.subr.bf16.mxu0 %v218_v53  ;;  %558 = vmatprep.subr.bf16.mxu1 %v220_v54  ;;  %v257_v53 = vunpack.c.l.s8.bf16 %v169_v51  ;;  %v259_v54 = vunpack.c.l.s8.bf16 %v171_v52 }
  0x72   :  { %477 = vmatpush1.bf16.msra.mxu0 %v217_v57  ;;  %559 = vmatpush1.bf16.msra.mxu1 %v219_v58  ;;  %v261_v57 = vunpack.c.h.s8.bf16 %v169_v51  ;;  %v263_v58 = vunpack.c.h.s8.bf16 %v171_v52  ;;  %v184_v51 = vld [vmem:[#allocation2 + $0x238] sm:$0xff] }
  0x73   :  { %478 = vmatprep.subr.bf16.mxu0 %v222_v59  ;;  %560 = vmatprep.subr.bf16.mxu1 %v224_v60  ;;  %v174_v59 = vld [vmem:[#allocation2 + $0x1e8] sm:$0xff]  ;;  %v176_v60 = vld [vmem:[#allocation2 + $0x1f8] sm:$0xff] }
  0x74   :  { %v266_v61 = vunpack.c.l.s8.bf16 %v174_v59  ;;  %v270_v3 = vunpack.c.h.s8.bf16 %v174_v59  ;;  %v272_v4 = vunpack.c.h.s8.bf16 %v176_v60 }
  0x76   :  { %479 = vmatpush1.bf16.msra.mxu0 %v221_v63  ;;  %561 = vmatpush1.bf16.msra.mxu1 %v223_v0  ;;  %v268_v63 = vunpack.c.l.s8.bf16 %v176_v60  ;;  %v265_v0 = vunpack.c.l.s8.bf16 %v173_v62 }
  0x77   :  { %480 = vmatprep.subr.bf16.mxu0 %v226_v1  ;;  %562 = vmatprep.subr.bf16.mxu1 %v228_v2  ;;  %v175_v1 = vld [vmem:[#allocation2 + $0x1f0] sm:$0xff] }
  0x78   :  { %v267_v2 = vunpack.c.l.s8.bf16 %v175_v1 }
  0x7a   :  { %481 = vmatpush1.bf16.msra.mxu0 %v225_v5  ;;  %563 = vmatpush1.bf16.msra.mxu1 %v227_v6  ;;  %v269_v5 = vunpack.c.h.s8.bf16 %v173_v62  ;;  %v271_v6 = vunpack.c.h.s8.bf16 %v175_v1  ;;  %v288_v62 = vunpack.c.h.s8.bf16 %v184_v51 }
  0x7b   :  { %482 = vmatprep.subr.bf16.mxu0 %v230_v7  ;;  %564 = vmatprep.subr.bf16.mxu1 %v232_v8  ;;  %v1664_v7 = vld [vmem:[#allocation2 + $0x208] sm:$0xff]  ;;  %v1666_v8 = vld [vmem:[#allocation2 + $0x218] sm:$0xff] }
  0x7c   :  { %v274_v9 = vunpack.c.l.s8.bf16 %v1664_v7  ;;  %v276_v10 = vunpack.c.l.s8.bf16 %v1666_v8 }
  0x7e   :  { %483 = vmatpush1.bf16.msra.mxu0 %v229_v11  ;;  %565 = vmatpush1.bf16.msra.mxu1 %v231_v12  ;;  %v440_v11 = vlaneseq }
  0x7f   :  { %484 = vmatprep.subr.bf16.mxu0 %v234_v13  ;;  %566 = vmatprep.subr.bf16.mxu1 %v236_v14 }
  0x80   :  { %v1670_v12 = vshrl.u32 %v440_v11, 7  ;;  %v190_v11 = vld [vmem:[#allocation2 + $0x268] sm:$0xff] }
  0x82   :  { %485 = vmatpush1.bf16.msra.mxu0 %v233_v17  ;;  %567 = vmatpush1.bf16.msra.mxu1 %v235_v18  ;;  %v442_v13 = vsub.s32 0, %v1670_v12  ;;  %v450_v14 = vsub.s32 2, %v1670_v12  ;;  %v446_v16 = vsub.s32 1, %v1670_v12  ;;  %v454_v17 = vsub.s32 3, %v1670_v12 }
  0x83   :  { %486 = vmatprep.subr.bf16.mxu0 %v238_v19  ;;  %568 = vmatprep.subr.bf16.mxu1 %v240_v20 }
  0x84   :  { %v443_v19 = vrot.slane %v438_v15, %v442_v13  ;;  %v451_v20 = vrot.slane %v438_v15, %v450_v14 }
  0x86   :  { %487 = vmatpush1.bf16.msra.mxu0 %v237_v23  ;;  %569 = vmatpush1.bf16.msra.mxu1 %v239_v24  ;;  %v447_v23 = vrot.slane %v438_v15, %v446_v16  ;;  %v455_v24 = vrot.slane %v438_v15, %v454_v17  ;;  %v192_v15 = vld [vmem:[#allocation2 + $0x278] sm:$0xff] }
  0x87   :  { %488 = vmatprep.subr.bf16.mxu0 %v242_v25  ;;  %570 = vmatprep.subr.bf16.mxu1 %v244_v26 }
  0x8a   :  { %489 = vmatpush1.bf16.msra.mxu0 %v241_v29  ;;  %571 = vmatpush1.bf16.msra.mxu1 %v243_v30 }
  0x8b   :  { %490 = vmatprep.subr.bf16.mxu0 %v246_v31  ;;  %572 = vmatprep.subr.bf16.mxu1 %v248_v32 }
  0x8e   :  { %491 = vmatpush1.bf16.msra.mxu0 %v245_v35  ;;  %573 = vmatpush1.bf16.msra.mxu1 %v247_v36 }
  0x8f   :  { %492 = vmatprep.subr.bf16.mxu0 %v250_v37  ;;  %574 = vmatprep.subr.bf16.mxu1 %v252_v38 }
  0x92   :  { %493 = vmatpush1.bf16.msra.mxu0 %v249_v41  ;;  %575 = vmatpush1.bf16.msra.mxu1 %v251_v42  ;;  %v179_v41 = vld [vmem:[#allocation2 + $0x210] sm:$0xff] }
  0x93   :  { %494 = vmatprep.subr.bf16.mxu0 %v254_v43  ;;  %576 = vmatprep.subr.bf16.mxu1 %v256_v44  ;;  %v275_v46 = vunpack.c.l.s8.bf16 %v179_v41 }
  0x96   :  { %495 = vmatpush1.bf16.msra.mxu0 %v253_v47  ;;  %577 = vmatpush1.bf16.msra.mxu1 %v255_v48  ;;  %v278_v48 = vunpack.c.h.s8.bf16 %v1664_v7 }
  0x97   :  { %496 = vmatprep.subr.bf16.mxu0 %v258_v49  ;;  %578 = vmatprep.subr.bf16.mxu1 %v260_v50  ;;  %v280_v49 = vunpack.c.h.s8.bf16 %v1666_v8  ;;  %v182_v50 = vld [vmem:[#allocation2 + $0x228] sm:$0xff] }
  0x9a   :  { %497 = vmatpush1.bf16.msra.mxu0 %v257_v53  ;;  %579 = vmatpush1.bf16.msra.mxu1 %v259_v54  ;;  %v277_v53 = vunpack.c.h.s8.bf16 %v177_v40  ;;  %v279_v54 = vunpack.c.h.s8.bf16 %v179_v41  ;;  %v198_v41 = vld [vmem:[#allocation2 + $0x2a8] sm:$0xff] }
  0x9b   :  { %498 = vmatprep.subr.bf16.mxu0 %v262_v55  ;;  %580 = vmatprep.subr.bf16.mxu1 %v264_v56  ;;  %v282_v55 = vunpack.c.l.s8.bf16 %v182_v50  ;;  %v284_v56 = vunpack.c.l.s8.bf16 %v184_v51  ;;  %v318_v51 = vunpack.c.h.s8.bf16 %v198_v41 }
  0x9e   :  { %499 = vmatpush1.bf16.msra.mxu0 %v261_v57  ;;  %581 = vmatpush1.bf16.msra.mxu1 %v263_v58  ;;  %v181_v57 = vld [vmem:[#allocation2 + $0x220] sm:$0xff]  ;;  %v183_v58 = vld [vmem:[#allocation2 + $0x230] sm:$0xff] }
  0x9f   :  { %500 = vmatprep.subr.bf16.mxu0 %v266_v61  ;;  %582 = vmatprep.subr.bf16.mxu1 %v268_v63  ;;  %v281_v59 = vunpack.c.l.s8.bf16 %v181_v57  ;;  %v283_v60 = vunpack.c.l.s8.bf16 %v183_v58  ;;  %v286_v61 = vunpack.c.h.s8.bf16 %v182_v50  ;;  %v186_v63 = vld [vmem:[#allocation2 + $0x248] sm:$0xff]  ;;  %v285_v1 = vunpack.c.h.s8.bf16 %v181_v57 }
  0xa2   :  { %501 = vmatpush1.bf16.msra.mxu0 %v265_v0  ;;  %583 = vmatpush1.bf16.msra.mxu1 %v267_v2  ;;  %v188_v0 = vld [vmem:[#allocation2 + $0x258] sm:$0xff]  ;;  %v287_v2 = vunpack.c.h.s8.bf16 %v183_v58 }
  0xa3   :  { %502 = vmatprep.subr.bf16.mxu0 %v270_v3  ;;  %584 = vmatprep.subr.bf16.mxu1 %v272_v4  ;;  %v290_v3 = vunpack.c.l.s8.bf16 %v186_v63  ;;  %v292_v4 = vunpack.c.l.s8.bf16 %v188_v0 }
  0xa6   :  { %503 = vmatpush1.bf16.msra.mxu0 %v269_v5  ;;  %585 = vmatpush1.bf16.msra.mxu1 %v271_v6  ;;  %v185_v5 = vld [vmem:[#allocation2 + $0x240] sm:$0xff]  ;;  %v187_v6 = vld [vmem:[#allocation2 + $0x250] sm:$0xff] }
  0xa7   :  { %513 = vmatprep.subr.bf16.mxu0 %v274_v9  ;;  %595 = vmatprep.subr.bf16.mxu1 %v276_v10  ;;  %v289_v7 = vunpack.c.l.s8.bf16 %v185_v5  ;;  %v291_v8 = vunpack.c.l.s8.bf16 %v187_v6  ;;  %v294_v9 = vunpack.c.h.s8.bf16 %v186_v63  ;;  %v296_v10 = vunpack.c.h.s8.bf16 %v188_v0 }
  0xab   :  { %v432_v18 = vpop.permute.xlu0 %431 }
 0x13c   :  { %v377_v21 = vpop.f32.mrb[0].mxu0  ;;  %v418_v22 = vpop.f32.mrb[0].mxu1 }
 0x13d   :  { %v434_v25 = vmul.f32 %v432_v18, %v377_v21  ;;  %v436_v26 = vmul.f32 %v432_v18, %v418_v22  ;;  %v379_v27 = vpop.f32.mrb[1].mxu0  ;;  %v420_v28 = vpop.f32.mrb[1].mxu1  ;;  %v300_v21 = vunpack.c.l.s8.bf16 %v192_v15  ;;  %v189_v22 = vld [vmem:[#allocation2 + $0x260] sm:$0xff] }
 0x13e   :  { %v435_v29 = vmul.f32 %v432_v18, %v379_v27  ;;  %v437_v30 = vmul.f32 %v432_v18, %v420_v28  ;;  %v381_v31 = vpop.f32.mrb[2].mxu0  ;;  %v422_v32 = vpop.f32.mrb[2].mxu1  ;;  %v293_v18 = vunpack.c.h.s8.bf16 %v185_v5  ;;  %v304_v27 = vunpack.c.h.s8.bf16 %v192_v15  ;;  %v194_v28 = vld [vmem:[#allocation2 + $0x288] sm:$0xff] }
 0x13f   :  { %v460_v33 = vadd.f32 %v443_v19, %v434_v25  ;;  %v1687_v34 = vadd.f32 %v451_v20, %v436_v26  ;;  %v382_v35 = vpop.f32.mrb[3].mxu0  ;;  %v423_v36 = vpop.f32.mrb[3].mxu1  ;;  %v295_v19 = vunpack.c.h.s8.bf16 %v187_v6  ;;  %v298_v20 = vunpack.c.l.s8.bf16 %v190_v11 }
 0x140   :  { %v461_v37 = vadd.f32 %v447_v23, %v435_v29  ;;  %v463_v38 = vadd.f32 %v455_v24, %v437_v30  ;;  %v191_v23 = vld [vmem:[#allocation2 + $0x270] sm:$0xff]  ;;  %v297_v24 = vunpack.c.l.s8.bf16 %v189_v22  ;;  %v302_v26 = vunpack.c.h.s8.bf16 %v190_v11  ;;  %v196_v29 = vld [vmem:[#allocation2 + $0x298] sm:$0xff]  ;;  %v193_v35 = vld [vmem:[#allocation2 + $0x280] sm:$0xff] }
 0x141   :  { %v464_v39 = vmax.f32 %v460_v33, 0.0  ;;  %v299_v25 = vunpack.c.l.s8.bf16 %v191_v23  ;;  %v301_v30 = vunpack.c.h.s8.bf16 %v189_v22  ;;  %v303_v31 = vunpack.c.h.s8.bf16 %v191_v23  ;;  %v195_v36 = vld [vmem:[#allocation2 + $0x290] sm:$0xff]  ;;  %v749_v22 = vld [vmem:[#allocation4 + $0x100] sm:$0xf] }
 0x142   :  { %v465_v42 = vmax.f32 %v461_v37, 0.0  ;;  %v467_v43 = vmax.f32 %v463_v38, 0.0  ;;  %v306_v32 = vunpack.c.l.s8.bf16 %v194_v28  ;;  %v308_v33 = vunpack.c.l.s8.bf16 %v196_v29 }
 0x143   :  { %v468_v47 = vpack.c.bf16 %v464_v39, %v464_v39  ;;  %v305_v37 = vunpack.c.l.s8.bf16 %v193_v35  ;;  %v307_v38 = vunpack.c.l.s8.bf16 %v195_v36  ;;  %v310_v39 = vunpack.c.h.s8.bf16 %v194_v28  ;;  %v1497_v28 = vld [vmem:[#allocation4 + $0x48] sm:$0xff]  }
 0x144   :  { %v469_v44 = vpack.c.bf16 %v465_v42, %v465_v42  ;;  %v471_v52 = vpack.c.bf16 %v467_v43, %v467_v43  ;;  %v312_v40 = vunpack.c.h.s8.bf16 %v196_v29  ;;  %v200_v42 = vld [vmem:[#allocation2 + $0x2b8] sm:$0xff]  ;;  %v309_v43 = vunpack.c.h.s8.bf16 %v193_v35  ;;  %v1499_v29 = vld [vmem:[#allocation4 + $0x8] sm:$0xff]   ;;  %v1503_v35 = vld [vmem:[#allocation4 + $0x10] sm:$0xff]  }
 0x146   :  { %504 = vmatprep.mubr.bf16.mxu0 %v469_v44  ;;  %586 = vmatprep.mubr.bf16.mxu1 %v469_v44  ;;  %v311_v44 = vunpack.c.h.s8.bf16 %v195_v36  ;;  %v1505_v36 = vld [vmem:[#allocation4 + $0x58] sm:$0xff]  }
 0x147   :  { %505 = vmatmul.mubr.bf16.vlgmr.msra.gmra.mrb[4].mxu0 %v468_v47  ;;  %587 = vmatmul.mubr.bf16.vlgmr.msra.gmra.mrb[4].mxu1 %v468_v47  ;;  %v197_v47 = vld [vmem:[#allocation2 + $0x2a0] sm:$0xff] }
 0x148   :  { %514 = vmatpush1.bf16.msra.mxu0 %v273_v45  ;;  %596 = vmatpush1.bf16.msra.mxu1 %v275_v46  ;;  %v314_v45 = vunpack.c.l.s8.bf16 %v198_v41  ;;  %v316_v46 = vunpack.c.l.s8.bf16 %v200_v42  ;;  %v1504_v41 = vld [vmem:[#allocation4 + $0x90] sm:$0xff]  }
 0x149   :  { %545 = vmatprep.mubr.bf16.mxu0 %v471_v52  ;;  %627 = vmatprep.mubr.bf16.mxu1 %v471_v52  ;;  %v320_v52 = vunpack.c.h.s8.bf16 %v200_v42  ;;  %v1506_v42 = vld [vmem:[#allocation4 + $0xd8] sm:$0xff]  }
 0x14a   :  { %515 = vmatprep.subr.bf16.mxu0 %v278_v48  ;;  %597 = vmatprep.subr.bf16.mxu1 %v280_v49  ;;  %v199_v48 = vld [vmem:[#allocation2 + $0x2b0] sm:$0xff]  ;;  %v313_v49 = vunpack.c.l.s8.bf16 %v197_v47 }
 0x14b   :  { %v315_v50 = vunpack.c.l.s8.bf16 %v199_v48 }
 0x14c   :  { %516 = vmatpush1.bf16.msra.mxu0 %v277_v53  ;;  %598 = vmatpush1.bf16.msra.mxu1 %v279_v54  ;;  %v202_v53 = vld [vmem:[#allocation2 + $0x2c8] sm:$0xff]  ;;  %v204_v54 = vld [vmem:[#allocation2 + $0x2d8] sm:$0xff] }
 0x14d   :  { %517 = vmatprep.subr.bf16.mxu0 %v282_v55  ;;  %599 = vmatprep.subr.bf16.mxu1 %v284_v56  ;;  %v317_v55 = vunpack.c.h.s8.bf16 %v197_v47  ;;  %v319_v56 = vunpack.c.h.s8.bf16 %v199_v48  ;;  %v322_v57 = vunpack.c.l.s8.bf16 %v202_v53  ;;  %v324_v58 = vunpack.c.l.s8.bf16 %v204_v54  ;;  %v1512_v47 = vld [vmem:[#allocation4 + $0xa0] sm:$0xff]   ;;  %v1514_v48 = vld [vmem:[#allocation4 + $0xe8] sm:$0xff]  }
 0x14e   :  { %v326_v63 = vunpack.c.h.s8.bf16 %v202_v53  ;;  %v328_v0 = vunpack.c.h.s8.bf16 %v204_v54  ;;  %v1519_v53 = vld [vmem:[#allocation4 + $0x30] sm:$0xff]  }
 0x14f   :  { %v1520_v54 = vld [vmem:[#allocation4 + $0xb0] sm:$0xff]  }
 0x150   :  { %518 = vmatpush1.bf16.msra.mxu0 %v281_v59  ;;  %600 = vmatpush1.bf16.msra.mxu1 %v283_v60  ;;  %v201_v59 = vld [vmem:[#allocation2 + $0x2c0] sm:$0xff]  ;;  %v203_v60 = vld [vmem:[#allocation2 + $0x2d0] sm:$0xff] }
 0x151   :  { %519 = vmatprep.subr.bf16.mxu0 %v286_v61  ;;  %601 = vmatprep.subr.bf16.mxu1 %v288_v62  ;;  %v321_v61 = vunpack.c.l.s8.bf16 %v201_v59  ;;  %v323_v62 = vunpack.c.l.s8.bf16 %v203_v60 }
 0x154   :  { %520 = vmatpush1.bf16.msra.mxu0 %v285_v1  ;;  %602 = vmatpush1.bf16.msra.mxu1 %v287_v2  ;;  %v206_v1 = vld [vmem:[#allocation2 + $0x2e8] sm:$0xff]  ;;  %v208_v2 = vld [vmem:[#allocation2 + $0x2f8] sm:$0xff] }
 0x155   :  { %521 = vmatprep.subr.bf16.mxu0 %v290_v3  ;;  %603 = vmatprep.subr.bf16.mxu1 %v292_v4  ;;  %v325_v3 = vunpack.c.h.s8.bf16 %v201_v59  ;;  %v327_v4 = vunpack.c.h.s8.bf16 %v203_v60  ;;  %v330_v5 = vunpack.c.l.s8.bf16 %v206_v1  ;;  %v332_v6 = vunpack.c.l.s8.bf16 %v208_v2  ;;  %v649_v59 = vld [vmem:[%s1748_s4 + $0x4] sm:$0xf]  ;;  %v643_v60 = vpop.permute.xlu0 %642 }
 0x156   :  { %v334_v11 = vunpack.c.h.s8.bf16 %v206_v1  ;;  %v336_v15 = vunpack.c.h.s8.bf16 %v208_v2  ;;  %v658_v1 = vrot.slane %v649_v59, %v446_v16  ;;  %v666_v2 = vrot.slane %v649_v59, %v454_v17 }
 0x158   :  { %522 = vmatpush1.bf16.msra.mxu0 %v289_v7  ;;  %604 = vmatpush1.bf16.msra.mxu1 %v291_v8  ;;  %v205_v7 = vld [vmem:[#allocation2 + $0x2e0] sm:$0xff]  ;;  %v207_v8 = vld [vmem:[#allocation2 + $0x2f0] sm:$0xff] }
 0x159   :  { %523 = vmatprep.subr.bf16.mxu0 %v294_v9  ;;  %605 = vmatprep.subr.bf16.mxu1 %v296_v10  ;;  %v329_v9 = vunpack.c.l.s8.bf16 %v205_v7  ;;  %v331_v10 = vunpack.c.l.s8.bf16 %v207_v8 }
 0x15c   :  { %524 = vmatpush1.bf16.msra.mxu0 %v293_v18  ;;  %606 = vmatpush1.bf16.msra.mxu1 %v295_v19  ;;  %v333_v18 = vunpack.c.h.s8.bf16 %v205_v7  ;;  %v335_v19 = vunpack.c.h.s8.bf16 %v207_v8 }
 0x15d   :  { %525 = vmatprep.subr.bf16.mxu0 %v298_v20  ;;  %607 = vmatprep.subr.bf16.mxu1 %v300_v21  ;;  %v466_v20 = vmax.f32 %v1687_v34, 0.0  ;;  %v1493_v21 = vld [vmem:[#allocation4 + $0x40] sm:$0xff]  }
 0x15e   :  { %v747_v34 = vld [vmem:[%s1745_s1] sm:$0xff] }
 0x15f   :  { %v470_v23 = vpack.c.bf16 %v466_v20, %v466_v20 }
 0x160   :  { %526 = vmatpush1.bf16.msra.mxu0 %v297_v24  ;;  %608 = vmatpush1.bf16.msra.mxu1 %v299_v25  ;;  %v1596_v24 = vmov 0.0   ;;  %v756_v25 = vsel %vm754_vm0, %v749_v22, 0 }
 0x161   :  { %527 = vmatprep.subr.bf16.mxu0 %v302_v26  ;;  %609 = vmatprep.subr.bf16.mxu1 %v304_v27  ;;  %v1494_v26 = vld [vmem:[#allocation4 + $0xc0] sm:$0xff]  }
 0x162   :  { %v1495_v27 = vld [vmem:[#allocation4] sm:$0xff]  }
 0x164   :  { %528 = vmatpush1.bf16.msra.mxu0 %v301_v30  ;;  %610 = vmatpush1.bf16.msra.mxu1 %v303_v31  ;;  %v1501_v30 = vld [vmem:[#allocation4 + $0x50] sm:$0xff]   ;;  %v748_v31 = vpack.c.bf16 %v747_v34, %v747_v34 }
 0x165   :  { %529 = vmatprep.subr.bf16.mxu0 %v306_v32  ;;  %611 = vmatprep.subr.bf16.mxu1 %v308_v33  ;;  %v1496_v32 = vld [vmem:[#allocation4 + $0x80] sm:$0xff]   ;;  %v1498_v33 = vld [vmem:[#allocation4 + $0xc8] sm:$0xff]  }
 0x168   :  { %530 = vmatpush1.bf16.msra.mxu0 %v305_v37  ;;  %612 = vmatpush1.bf16.msra.mxu1 %v307_v38  ;;  %v1500_v37 = vld [vmem:[#allocation4 + $0x88] sm:$0xff]   ;;  %v1502_v38 = vld [vmem:[#allocation4 + $0xd0] sm:$0xff]  }
 0x169   :  { %531 = vmatprep.subr.bf16.mxu0 %v310_v39  ;;  %613 = vmatprep.subr.bf16.mxu1 %v312_v40  ;;  %v1507_v39 = vld [vmem:[#allocation4 + $0x18] sm:$0xff]   ;;  %v1509_v40 = vld [vmem:[#allocation4 + $0x60] sm:$0xff]  }
 0x16c   :  { %532 = vmatpush1.bf16.msra.mxu0 %v309_v43  ;;  %614 = vmatpush1.bf16.msra.mxu1 %v311_v44  ;;  %v1511_v43 = vld [vmem:[#allocation4 + $0x20] sm:$0xff]   ;;  %v1513_v44 = vld [vmem:[#allocation4 + $0x68] sm:$0xff]  }
 0x16d   :  { %533 = vmatprep.subr.bf16.mxu0 %v314_v45  ;;  %615 = vmatprep.subr.bf16.mxu1 %v316_v46  ;;  %v1508_v45 = vld [vmem:[#allocation4 + $0x98] sm:$0xff]   ;;  %v1510_v46 = vld [vmem:[#allocation4 + $0xe0] sm:$0xff]  }
 0x170   :  { %534 = vmatpush1.bf16.msra.mxu0 %v313_v49  ;;  %616 = vmatpush1.bf16.msra.mxu1 %v315_v50  ;;  %v1515_v49 = vld [vmem:[#allocation4 + $0x28] sm:$0xff]  }
 0x171   :  { %535 = vmatprep.subr.bf16.mxu0 %v318_v51  ;;  %617 = vmatprep.subr.bf16.mxu1 %v320_v52  ;;  %v1516_v50 = vld [vmem:[#allocation4 + $0xa8] sm:$0xff]   ;;  %v1517_v51 = vld [vmem:[#allocation4 + $0x70] sm:$0xff]  }
 0x172   :  { %v1518_v52 = vld [vmem:[#allocation4 + $0xf0] sm:$0xff]  }
 0x174   :  { %536 = vmatpush1.bf16.msra.mxu0 %v317_v55  ;;  %618 = vmatpush1.bf16.msra.mxu1 %v319_v56  ;;  %v1521_v55 = vld [vmem:[#allocation4 + $0x78] sm:$0xff]  }
 0x175   :  { %537 = vmatprep.subr.bf16.mxu0 %v322_v57  ;;  %619 = vmatprep.subr.bf16.mxu1 %v324_v58  ;;  %v1522_v56 = vld [vmem:[#allocation4 + $0xf8] sm:$0xff]  }
 0x176   :  { %v1523_v57 = vld [vmem:[#allocation4 + $0x38] sm:$0xff]  }
 0x177   :  { %v1524_v58 = vld [vmem:[#allocation4 + $0xb8] sm:$0xff]  }
 0x178   :  { %538 = vmatpush1.bf16.msra.mxu0 %v321_v61  ;;  %620 = vmatpush1.bf16.msra.mxu1 %v323_v62  ;;  %v654_v61 = vrot.slane %v649_v59, %v442_v13  ;;  %v662_v62 = vrot.slane %v649_v59, %v450_v14 }
 0x179   :  { %539 = vmatprep.subr.bf16.mxu0 %v326_v63  ;;  %621 = vmatprep.subr.bf16.mxu1 %v328_v0 }
 0x17c   :  { %540 = vmatpush1.bf16.msra.mxu0 %v325_v3  ;;  %622 = vmatpush1.bf16.msra.mxu1 %v327_v4 }
 0x17d   :  { %541 = vmatprep.subr.bf16.mxu0 %v330_v5  ;;  %623 = vmatprep.subr.bf16.mxu1 %v332_v6 }
 0x180   :  { %542 = vmatpush1.bf16.msra.mxu0 %v329_v9  ;;  %624 = vmatpush1.bf16.msra.mxu1 %v331_v10 }
 0x181   :  { %543 = vmatprep.subr.bf16.mxu0 %v334_v11  ;;  %625 = vmatprep.subr.bf16.mxu1 %v336_v15 }
 0x184   :  { %544 = vmatpush1.bf16.msra.mxu0 %v333_v18  ;;  %626 = vmatpush1.bf16.msra.mxu1 %v335_v19 }
 0x185   :  { %1429 = vmatprep.subr.bf16.mxu0 %v1596_v24  ;;  %1367 = vmatprep.subr.bf16.mxu1 %v1493_v21 }
 0x187   :  { %546 = vmatmul.mubr.bf16.vlgmr.msra.gmra.mrb[4].mxu0 %v470_v23  ;;  %628 = vmatmul.mubr.bf16.vlgmr.msra.gmra.mrb[4].mxu1 %v470_v23 }
 0x188   :  { %1430 = vmatpush3.bf16.msra.mxu0 %v756_v25  ;;  %1431 = vmatprep.mubr.msk.bf16.mxu0 %vm1597_vm1, %v1596_v24  ;;  %v1525_v25 = vld [vmem:[#allocation4 + $0x108] sm:$0xff]  }
 0x189   :  { %1389 = vmatprep.subr.bf16.mxu0 %v1494_v26  ;;  %1368 = vmatpush3.bf16.msra.mxu1 %v1495_v27 }
 0x18a   :  { %1369 = vmatprep.subr.bf16.mxu1 %v1497_v28 }
 0x18d   :  { %1370 = vmatpush3.bf16.msra.mxu1 %v1499_v29 }
 0x18e   :  { %1371 = vmatprep.subr.bf16.mxu1 %v1501_v30  ;;  %v1526_v30 = vld [vmem:[#allocation4 + $0x110] sm:$0xff]  }
 0x18f   :  { %1432 = vmatmul.mubr.msk.bf16.vlgmr.msra.gmra.mrb[8].mxu0 %vm750_vm2, %v748_v31  ;;  %v1527_v31 = vld [vmem:[#allocation4 + $0x118] sm:$0xff]  }
 0x190   :  { %1390 = vmatpush3.bf16.msra.mxu0 %v1496_v32  ;;  %v1528_v32 = vld [vmem:[#allocation4 + $0x120] sm:$0xff]  }
 0x191   :  { %1391 = vmatprep.subr.bf16.mxu0 %v1498_v33  ;;  %1372 = vmatpush3.bf16.msra.mxu1 %v1503_v35  ;;  %v1529_v33 = vld [vmem:[#allocation4 + $0x128] sm:$0xff]   ;;  %v1530_v35 = vld [vmem:[#allocation4 + $0x130] sm:$0xff]  }
 0x192   :  { %1373 = vmatprep.subr.bf16.mxu1 %v1505_v36  ;;  %v1531_v36 = vld [vmem:[#allocation4 + $0x138] sm:$0xff]  }
 0x194   :  { %1392 = vmatpush3.bf16.msra.mxu0 %v1500_v37  ;;  %v1532_v37 = vld [vmem:[#allocation4 + $0x140] sm:$0xff]  }
 0x195   :  { %1393 = vmatprep.subr.bf16.mxu0 %v1502_v38  ;;  %1374 = vmatpush3.bf16.msra.mxu1 %v1507_v39  ;;  %v1533_v38 = vld [vmem:[#allocation4 + $0x148] sm:$0xff]   ;;  %v1534_v39 = vld [vmem:[#allocation4 + $0x150] sm:$0xff]  }
 0x196   :  { %1375 = vmatprep.subr.bf16.mxu1 %v1509_v40  ;;  %v1535_v40 = vld [vmem:[#allocation4 + $0x158] sm:$0xff]  }
 0x198   :  { %1394 = vmatpush3.bf16.msra.mxu0 %v1504_v41  ;;  %v1536_v41 = vld [vmem:[#allocation4 + $0x160] sm:$0xff]  }
 0x199   :  { %1395 = vmatprep.subr.bf16.mxu0 %v1506_v42  ;;  %1376 = vmatpush3.bf16.msra.mxu1 %v1511_v43  ;;  %v1537_v42 = vld [vmem:[#allocation4 + $0x168] sm:$0xff]   ;;  %v1538_v43 = vld [vmem:[#allocation4 + $0x170] sm:$0xff]  }
 0x19a   :  { %1377 = vmatprep.subr.bf16.mxu1 %v1513_v44 }
 0x19c   :  { %1396 = vmatpush3.bf16.msra.mxu0 %v1508_v45 }
 0x19d   :  { %1397 = vmatprep.subr.bf16.mxu0 %v1510_v46  ;;  %1378 = vmatpush3.bf16.msra.mxu1 %v1515_v49 }
 0x19e   :  { %1379 = vmatprep.subr.bf16.mxu1 %v1517_v51 }
 0x1a0   :  { %1398 = vmatpush3.bf16.msra.mxu0 %v1512_v47 }
 0x1a1   :  { %1399 = vmatprep.subr.bf16.mxu0 %v1514_v48  ;;  %1380 = vmatpush3.bf16.msra.mxu1 %v1519_v53 }
 0x1a2   :  { %1381 = vmatprep.subr.bf16.mxu1 %v1521_v55  ;;  %v1346_v55 = vld [vmem:[%s1748_s4 + $0x8] ss:$0 sm:$0xff] }
 0x1a4   :  { %1400 = vmatpush3.bf16.msra.mxu0 %v1516_v50 }
 0x1a5   :  { %1401 = vmatprep.subr.bf16.mxu0 %v1518_v52  ;;  %1382 = vmatpush3.bf16.msra.mxu1 %v1523_v57 }
 0x1a6   :  { %1435 = vmatprep.subr.bf16.mxu1 %v1596_v24 }
 0x1a8   :  { %1402 = vmatpush3.bf16.msra.mxu0 %v1520_v54 }
 0x1a9   :  { %1403 = vmatprep.subr.bf16.mxu0 %v1522_v56 }
 0x1ac   :  { %1404 = vmatpush3.bf16.msra.mxu0 %v1524_v58 }
 0x1ad   :  { %1455 = vmatprep.subr.bf16.mxu0 %v1596_v24 }
 0x25a   :  { %v547_v63 = vpop.f32.mrb[4].mxu0  ;;  %v629_v0 = vpop.f32.mrb[4].mxu1 }
 0x25b   :  { %v645_v3 = vmul.f32 %v643_v60, %v547_v63  ;;  %v647_v4 = vmul.f32 %v643_v60, %v629_v0  ;;  %v549_v5 = vpop.f32.mrb[5].mxu0  ;;  %v631_v6 = vpop.f32.mrb[5].mxu1 }
 0x25c   :  { %v646_v7 = vmul.f32 %v643_v60, %v549_v5  ;;  %v648_v8 = vmul.f32 %v643_v60, %v631_v6  ;;  %v551_v9 = vpop.f32.mrb[6].mxu0  ;;  %v633_v10 = vpop.f32.mrb[6].mxu1  ;;  %v1539_v60 = vld [vmem:[#allocation4 + $0x178] sm:$0xff]   ;;  %v1356_v6 = vld [vmem:[%s1748_s4 + $0xa] ss:$0 sm:$0xff] }
 0x25d   :  { %v671_v13 = vadd.f32 %v654_v61, %v645_v3  ;;  %v673_v11 = vadd.f32 %v662_v62, %v647_v4  ;;  %v552_v15 = vpop.f32.mrb[7].mxu0  ;;  %v634_v14 = vpop.f32.mrb[7].mxu1  ;;  %v1540_v61 = vld [vmem:[#allocation4 + $0x180] sm:$0xff]   ;;  %v1347_v62 = vld [vmem:[%s1748_s4 + $0x9] ss:$0 sm:$0xff] }
 0x25e   :  { %v672_v18 = vadd.f32 %v658_v1, %v646_v7  ;;  %v674_v19 = vadd.f32 %v666_v2, %v648_v8 }
 0x25f   :  { %v675_v20 = vmax.f32 %v671_v13, 0.0  ;;  %v677_v21 = vmax.f32 %v673_v11, 0.0 }
 0x260   :  { %v676_v16 = vmax.f32 %v672_v18, 0.0  ;;  %v678_v22 = vmax.f32 %v674_v19, 0.0 }
 0x261   :  { %v679_v26 = vpack.c.bf16 %v675_v20, %v675_v20  ;;  %v681_v27 = vpack.c.bf16 %v677_v21, %v677_v21 }
 0x262   :  { %v680_v12 = vpack.c.bf16 %v676_v16, %v676_v16  ;;  %v682_v17 = vpack.c.bf16 %v678_v22, %v678_v22  ;;  %v1711_v23 = vpop.f32.mrb[8].mxu0 }
 0x263   :  { %v1433_v28 = vpop.f32.mrb[9].mxu0 }
 0x264   :  { %1022 = vmatprep.mubr.bf16.mxu1 %v680_v12  ;;  %1062 = vmatprep.mubr.bf16.mxu0 %v682_v17  ;;  %v795_v34 = vpop.f32.mrb[10].mxu0 }
 0x265   :  { %1023 = vmatmul.mubr.bf16.vlgmr.msra.gmra.mrb[8].mxu1 %v679_v26  ;;  %1063 = vmatmul.mubr.bf16.vlgmr.msra.gmra.mrb[12].mxu0 %v681_v27  ;;  %v1434_v29 = vpop.f32.mrb[11].mxu0 }
 0x266   :  { %1436 = vmatpush3.bf16.msra.mxu1 %v1525_v25  ;;  %1451 = vmatprep.mubr.msk.bf16.mxu1 %vm1597_vm1, %v1596_v24 }
 0x267   :  { %1437 = vmatprep.subr.bf16.mxu1 %v1596_v24  ;;  %1471 = vmatprep.mubr.msk.bf16.mxu0 %vm1597_vm1, %v1596_v24 }
 0x268   :  { %1456 = vmatpush3.bf16.msra.mxu0 %v1533_v38 }
 0x269   :  { %1457 = vmatprep.subr.bf16.mxu0 %v1596_v24 }
 0x26a   :  { %1438 = vmatpush3.bf16.msra.mxu1 %v1526_v30 }
 0x26b   :  { %1439 = vmatprep.subr.bf16.mxu1 %v1596_v24 }
 0x26c   :  { %1458 = vmatpush3.bf16.msra.mxu0 %v1534_v39 }
 0x26d   :  { %1459 = vmatprep.subr.bf16.mxu0 %v1596_v24 }
 0x26e   :  { %1440 = vmatpush3.bf16.msra.mxu1 %v1527_v31 }
 0x26f   :  { %1441 = vmatprep.subr.bf16.mxu1 %v1596_v24 }
 0x270   :  { %1460 = vmatpush3.bf16.msra.mxu0 %v1535_v40 }
 0x271   :  { %1461 = vmatprep.subr.bf16.mxu0 %v1596_v24 }
 0x272   :  { %1442 = vmatpush3.bf16.msra.mxu1 %v1528_v32 }
 0x273   :  { %1443 = vmatprep.subr.bf16.mxu1 %v1596_v24 }
 0x274   :  { %1462 = vmatpush3.bf16.msra.mxu0 %v1536_v41 }
 0x275   :  { %1463 = vmatprep.subr.bf16.mxu0 %v1596_v24 }
 0x276   :  { %1444 = vmatpush3.bf16.msra.mxu1 %v1529_v33 }
 0x277   :  { %1445 = vmatprep.subr.bf16.mxu1 %v1596_v24 }
 0x278   :  { %1464 = vmatpush3.bf16.msra.mxu0 %v1537_v42 }
 0x279   :  { %1465 = vmatprep.subr.bf16.mxu0 %v1596_v24 }
 0x27a   :  { %1446 = vmatpush3.bf16.msra.mxu1 %v1530_v35 }
 0x27b   :  { %1447 = vmatprep.subr.bf16.mxu1 %v1596_v24 }
 0x27c   :  { %1466 = vmatpush3.bf16.msra.mxu0 %v1538_v43 }
 0x27d   :  { %1467 = vmatprep.subr.bf16.mxu0 %v1596_v24 }
 0x27e   :  { %1448 = vmatpush3.bf16.msra.mxu1 %v1531_v36 }
 0x27f   :  { %1449 = vmatprep.subr.bf16.mxu1 %v1596_v24 }
 0x280   :  { %1468 = vmatpush3.bf16.msra.mxu0 %v1539_v60 }
 0x281   :  { %1469 = vmatprep.subr.bf16.mxu0 %v1596_v24 }
 0x282   :  { %1450 = vmatpush3.bf16.msra.mxu1 %v1532_v37 }
 0x284   :  { %1470 = vmatpush3.bf16.msra.mxu0 %v1540_v61 }
 0x338   :  { %v1383_v44 = vpop.f32.mrb[8].mxu1  ;;  %v1405_v45 = vpop.f32.mrb[12].mxu0 }
 0x339   :  { %v1384_v46 = vpop.f32.mrb[9].mxu1  ;;  %v1406_v47 = vpop.f32.mrb[13].mxu0 }
 0x33a   :  { %v1385_v48 = vadd.f32 %v1384_v46, %v1383_v44  ;;  %v1407_v49 = vadd.f32 %v1406_v47, %v1405_v45  ;;  %v1386_v50 = vpop.f32.mrb[10].mxu1  ;;  %v1408_v51 = vpop.f32.mrb[14].mxu0 }
 0x33b   :  { %v1387_v52 = vpop.f32.mrb[11].mxu1  ;;  %v1409_v53 = vpop.f32.mrb[15].mxu0 }
 0x33c   :  { %v1025_v54 = vadd.f32 %v1385_v48, %v1711_v23 }
 0x33e   :  { %v1065_v56 = vadd.f32 %v1407_v49, %v1025_v54 }
 0x340   :  { %v1077_v57 = vadd.f32 %v1346_v55, %v1065_v56 }
 0x342   :  { %v1078_v58 = vmax.f32 %v1077_v57, 0.0 }
 0x344   :  { %v1079_v59 = vpack.c.bf16 %v1078_v58, %v1078_v58 }
 0x346   :  { %1452 = vmatmul.mubr.bf16.vlgmr.msra.gmra.mrb[12].mxu1 %v1079_v59 }
 0x419   :  { %v1185_v63 = vpop.f32.mrb[12].mxu1 }
 0x41a   :  { %v1186_v0 = vadd.f32 %v1347_v62, %v1185_v63  ;;  %v1453_v1 = vpop.f32.mrb[13].mxu1 }
 0x41b   :  { %v1188_v2 = vpop.f32.mrb[14].mxu1 }
 0x41c   :  { %v1191_v3 = vmax.f32 %v1186_v0, 0.0  ;;  %v1454_v4 = vpop.f32.mrb[15].mxu1 }
 0x41e   :  { %v1192_v5 = vpack.c.bf16 %v1191_v3, %v1191_v3 }
 0x420   :  { %1472 = vmatmul.mubr.bf16.vlgmr.msra.gmra.mrb[16].mxu0 %v1192_v5 }
 0x4f3   :  { %v1298_v7 = vpop.f32.mrb[16].mxu0 }
 0x4f4   :  { %v1299_v24 = vadd.f32 %v1356_v6, %v1298_v7  ;;  %v1473_v8 = vpop.f32.mrb[17].mxu0 }
 0x4f5   :  { %v1301_v9 = vpop.f32.mrb[18].mxu0 }
 0x4f6   :  { %1304 = vst [vmem:[%s1749_s5] sm:$0xff] %v1299_v24  ;;  %v1474_v10 = vpop.f32.mrb[19].mxu0 }
 0x4f7   :  { %1309 = vsyncpa [#allocation3], 1 }
 0x4f8   :  { %1310 = vsyncpa [#allocation5], 1 }

</bundles_post_ra>
